<compile_context>
chip_gen: v5e
topology: v5e:2x2
jax: 0.10.0
libtpu: 0.0.40
codegen_flags: <defaults>
</compile_context>

<pallas_src>
import numpy as np
import jax
import jax.numpy as jnp
from jax.experimental import pallas as pl
from jax.experimental.pallas import tpu as pltpu

LANES = 128  # lane width; the cluster axis is padded to a multiple of this


def _round_up(x, m):
    return (x + m - 1) // m * m


def _vmem_ceiling_bytes():
    # 3/4 of physical VMEM: ~96 MiB on v5e/v6e (128 MiB), ~48 MiB on v7x (64 MiB),
    # leaving headroom for compiler-internal scratch.
    cap = 64 << 20
    try:
        cap = int(getattr(pltpu.get_tpu_info(), "vmem_capacity_bytes", cap))
    except Exception:
        cap = 64 << 20
    return max(16 << 20, (cap * 3) // 4)


def _vmem_limit_bytes(block_bytes):
    need = 3 * block_bytes + (4 << 20)     # double-buffering + f32 temporaries + headroom
    return int(min(max(need, 16 << 20), _vmem_ceiling_bytes()))


def _batches_per_step(num_batches, batch_size, d, target_bytes=4 << 20):
    """k logical batches per grid step so the bf16 x tile is ~target_bytes (amortizes the
    ~0.35us/step grid overhead); k must divide num_batches."""
    per_batch = max(1, batch_size * d * 2)             # bf16 bytes of one logical batch
    k = max(1, min(num_batches, target_bytes // per_batch))
    while num_batches % k:
        k -= 1
    return int(k)


# --------------------------------------------------------------------------------------
# Center kernel: runs once per forward().
# --------------------------------------------------------------------------------------
def center_kernel(params_ref, reps_ref, centers_ref, c2_ref):
    # params_ref : [C, S]       per-cluster logits over that cluster's samples
    # reps_ref   : [C, S, D]    sample_reps stacked per cluster
    # centers_ref: [C_pad, D]   bf16, holds 2*center (the 2x of the distance is prefolded);
    #                           padded cluster rows are zero
    # c2_ref     : [C_pad, 1]   f32 |center|^2 column; padded rows get 1e30 (softmax mask)
    C, S = params_ref.shape
    c_pad = centers_ref.shape[0]

    # softmax over samples (torch: F.softmax(self.param_list[i], 0))
    p = params_ref[...].astype(jnp.float32)
    p = p - jnp.max(p, axis=-1, keepdims=True)
    e = jnp.exp(p)
    w = e / jnp.sum(e, axis=-1, keepdims=True)                       # [C, S]

    # centers[c] = sum_s w[c,s] * reps[c,s,:]  -- batched MXU contraction over S
    # (no [C,S,D] f32 broadcast temporary; review item for v7x's 64 MiB VMEM).
    reps = reps_ref[...].astype(jnp.float32)                         # [C, S, D]
    centers = jax.lax.dot_general(
        w[:, None, :], reps, (((2,), (1,)), ((0,), (0,))),
        preferred_element_type=jnp.float32)[:, 0, :]                 # [C, D]

    # Pad the cluster axis C -> C_pad with a tiny one-hot matmul (single full-tile result,
    # no masked partial stores); padded rows come out exactly zero.
    row = jax.lax.broadcasted_iota(jnp.int32, (c_pad, C), 0)
    col = jax.lax.broadcasted_iota(jnp.int32, (c_pad, C), 1)
    eye_pad = (row == col).astype(jnp.float32)                       # [C_pad, C]
    centers_pad = jnp.dot(eye_pad, centers,
                          preferred_element_type=jnp.float32)        # [C_pad, D] f32

    # |c|^2 as a column (lane reduction, already in the orientation the loss kernel wants);
    # padded rows get 1e30 so their logits become ~ -inf.  MUST stay f32.
    c2 = jnp.sum(centers_pad * centers_pad, axis=-1, keepdims=True)  # [C_pad, 1]
    rid = jax.lax.broadcasted_iota(jnp.int32, (c_pad, 1), 0)
    c2_ref[...] = jnp.where(rid < C, c2, jnp.float32(1e30))

    # Fold the 2x of  -(|x|^2 + |c|^2 - 2 x.c)  into the stored centers and down-cast to
    # bf16 for the hot MXU matmul (accumulation stays f32 in the loss kernel).
    centers_ref[...] = (2.0 * centers_pad).astype(jnp.bfloat16)


def compute_center(params, sample_reps):
    C, S = params.shape
    D = sample_reps.shape[-1]
    # TODO(synk): round c_pad to 256 on v6e/v7x when C > 128 to match their 256-wide MXUs.
    c_pad = _round_up(max(C, LANES), LANES)
    block_bytes = (C * S * 4 + C * S * D * 4          # params + reps input blocks
                   + c_pad * D * (4 + 2) + c_pad * 4  # f32 padded centers + bf16 out + c2
                   + C * D * 4)                       # unpadded centers temp
    # TODO(synk): for very large C*S*D, tile this over clusters (grid=(C//c_tile,)) so the
    #             reps block pipelines and fits v7x's 64 MiB VMEM instead of one monolithic DMA.
    return pl.pallas_call(
        center_kernel,
        out_shape=(jax.ShapeDtypeStruct((c_pad, D), jnp.bfloat16),
                   jax.ShapeDtypeStruct((c_pad, 1), jnp.float32)),
        grid=(1,),
        in_specs=[
            pl.BlockSpec((C, S), lambda i: (0, 0)),
            pl.BlockSpec((C, S, D), lambda i: (0, 0, 0)),
        ],
        out_specs=(
            pl.BlockSpec((c_pad, D), lambda i: (0, 0)),
            pl.BlockSpec((c_pad, 1), lambda i: (0, 0)),
        ),
        compiler_params=pltpu.CompilerParams(
            vmem_limit_bytes=_vmem_limit_bytes(block_bytes)),
    )(params, sample_reps)


# --------------------------------------------------------------------------------------
# Loss kernel: one grid step = k logical batches.
# --------------------------------------------------------------------------------------
def loss_kernel(x_ref, labels_ref, centers_ref, c2_ref, out_ref):
    # x_ref      : [kB, D]        bf16 permuted embeddings for k logical batches
    # labels_ref : [1, 1, kB]     int32 labels, lane-dense
    # centers_ref: [C_pad, D]     bf16 2*centers, resident across the grid
    # c2_ref     : [C_pad, 1]     f32 |c|^2 column, resident; 1e30 on padded rows
    # out_ref    : [1, 1, k]      f32 loss per logical batch of this step
    kb = labels_ref.shape[-1]
    k = out_ref.shape[-1]
    B = kb // k
    c_pad = centers_ref.shape[0]

    # Logits with samples on lanes, clusters on sublanes (no in-kernel relayouts anywhere):
    #   dis[c, r] = 2 x_r . c_c - |c_c|^2     (per-sample |x|^2 constant dropped -- CE is
    # shift-invariant per sample).  bf16 operands, f32 accumulation.
    dis = jax.lax.dot_general(
        centers_ref[...], x_ref[...], (((1,), (1,)), ((), ())),
        preferred_element_type=jnp.float32)                          # [C_pad, kB]
    dis = dis - c2_ref[...]                                          # padded rows ~ -1e30

    # log-sum-exp per sample (column)
    m = jnp.max(dis, axis=0, keepdims=True)                          # [1, kB]
    lse = jnp.log(jnp.sum(jnp.exp(dis - m), axis=0, keepdims=True)) + m

    # target logit per sample via a lane-aligned one-hot mask (labels stay lane-oriented)
    cluster = jax.lax.broadcasted_iota(jnp.int32, (c_pad, kb), 0)
    onehot = cluster == labels_ref[0]                                # [C_pad, kB]
    tgt = jnp.sum(jnp.where(onehot, dis, 0.0), axis=0, keepdims=True)  # [1, kB]

    per_sample = lse - tgt                                           # [1, kB] CE terms

    # mean per logical batch: one tiny MXU matmul against a [kB, k] block mask
    r_iota = jax.lax.broadcasted_iota(jnp.int32, (kb, k), 0)
    b_iota = jax.lax.broadcasted_iota(jnp.int32, (kb, k), 1)
    sel = jnp.logical_and(r_iota >= b_iota * B,
                          r_iota < (b_iota + 1) * B).astype(jnp.float32)
    ce = jnp.dot(per_sample, sel, preferred_element_type=jnp.float32) * (1.0 / B)  # [1, k]

    # forward(): loss_w = loss.detach(); loss = (loss_w/(loss_w.sum()+1e-7) * loss).mean()
    # -> scalar per batch: ce^2 / (ce + 1e-7)
    out_ref[0] = ce * ce / (ce + 1e-7)


def batched_losses(data_perm, labels_3d, centers2, c2, batch_size, k):
    rows, D = data_perm.shape
    c_pad = centers2.shape[0]
    num_steps = labels_3d.shape[0]
    kb = k * batch_size
    block_bytes = (2 * kb * D * 2            # double-buffered bf16 x tiles
                   + kb * 4                  # labels block
                   + c_pad * D * 2 + c_pad * 4   # resident 2*centers (bf16) + |c|^2
                   + 2 * c_pad * kb * 4)     # f32 logits / exp temporaries
    # TODO(synk): on v7x verify both TensorCores pick up the batch axis; if one idles,
    #             switch to pltpu.CORE_PARALLEL / an explicit 2-way leading grid axis.
    return pl.pallas_call(
        loss_kernel,
        out_shape=jax.ShapeDtypeStruct((num_steps, 1, k), jnp.float32),
        grid=(num_steps,),
        in_specs=[
            pl.BlockSpec((kb, D), lambda i: (i, 0)),
            pl.BlockSpec((1, 1, kb), lambda i: (i, 0, 0)),
            pl.BlockSpec((c_pad, D), lambda i: (0, 0)),   # resident across all steps
            pl.BlockSpec((c_pad, 1), lambda i: (0, 0)),   # resident across all steps
        ],
        out_specs=pl.BlockSpec((1, 1, k), lambda i: (i, 0, 0)),
        compiler_params=pltpu.CompilerParams(
            dimension_semantics=("parallel",),
            vmem_limit_bytes=_vmem_limit_bytes(block_bytes)),
    )(data_perm, labels_3d, centers2, c2)


def embedding_center_forward(params, sample_reps, data, labels, perm, batch_size):
    """Returns one loss per yielded batch of the torch generator, shape [num_batches, 1]."""
    N, D = data.shape
    num_batches = N // batch_size
    # TODO(synk): the torch generator yields one partial batch only when N < batch_size and
    #             otherwise drops the trailing partial batch; only the latter is modeled here.
    assert num_batches >= 1, "demo requires N >= batch_size"
    rows = num_batches * batch_size

    # Centers / |c|^2 are constant over forward() -- computed once, O(1).
    centers2_bf16, c2_col = compute_center(params, sample_reps)

    # Permutation gather done once in XLA; data cast to bf16 first so the gathered stream
    # (and every HBM re-read in the loss loop) is half the bytes.
    # TODO(synk): fuse the gather into the loss kernel (scalar-prefetch `perm`, data in
    #             pl.ANY + per-row make_async_copy) once D*4B >= ~1 KiB/row; at the demo's
    #             D=32 the per-row DMAs would be too small to be efficient.
    data_perm = data.astype(jnp.bfloat16)[perm[:rows]]
    labels_perm = labels[perm[:rows]].astype(jnp.int32)

    k = _batches_per_step(num_batches, batch_size, D)
    num_steps = num_batches // k
    labels_3d = labels_perm.reshape(num_steps, 1, k * batch_size)    # lane-dense labels

    losses = batched_losses(data_perm, labels_3d, centers2_bf16, c2_col, batch_size, k)
    return losses.reshape(num_batches, 1)


# --------------------------------------------------------------------------------------
# Pure-JAX f32 reference (torch formula, including the |x|^2 term) for validation.
# --------------------------------------------------------------------------------------
def reference_losses(params, sample_reps, data, labels, perm, batch_size):
    w = jax.nn.softmax(params.astype(jnp.float32), axis=-1)                  # [C, S]
    centers = jnp.einsum('cs,csd->cd', w, sample_reps.astype(jnp.float32))   # [C, D]
    N = data.shape[0]
    nb = N // batch_size
    dp = data[perm][: nb * batch_size].astype(jnp.float32)
    lp = labels[perm][: nb * batch_size].astype(jnp.int32)
    out = []
    for b in range(nb):
        x = dp[b * batch_size:(b + 1) * batch_size]
        y = lp[b * batch_size:(b + 1) * batch_size]
        dis = -jnp.sum((x[:, :, None] - centers.T[None, :, :]) ** 2, axis=1)  # [B, C]
        logp = jax.nn.log_softmax(dis, axis=-1)
        ce = -jnp.mean(logp[jnp.arange(batch_size), y])
        out.append(ce * ce / (ce + 1e-7))
    return jnp.stack(out)[:, None]


if __name__ == "__main__":
    key = jax.random.PRNGKey(0)
    C = 4            # number of clusters (len(sample_reps))
    S = 8            # samples per cluster
    D = 32           # embedding dim
    batch_size = 8   # small stand-in for the default 2048

    k_reps, k_params, k_perm = jax.random.split(key, 3)

    # sample_reps[i] ~ randn(S, D); param_list[i] ~ randn(S)
    sample_reps = jax.random.normal(k_reps, (C, S, D), dtype=jnp.float32)
    params = jax.random.normal(k_params, (C, S), dtype=jnp.float32)

    # __init__ glue: concat data, build labels, filter by loss_weights > 0
    data_all = sample_reps.reshape(C * S, D)
    labels_all = jnp.repeat(jnp.arange(C, dtype=jnp.int32), S)
    loss_weights = jnp.where(jnp.arange(C * S) % 4 == 3, 0.0, 1.0)   # drop every 4th sample
    mask = np.asarray(loss_weights > 0)
    data = data_all[mask]            # [24, 32]
    labels = labels_all[mask]        # [24]
    N = data.shape[0]

    # forward(): random.shuffle(self.index) -> deterministic permutation here
    perm = jax.random.permutation(k_perm, N)

    losses = embedding_center_forward(params, sample_reps, data, labels, perm, batch_size)
    losses = jax.block_until_ready(losses)   # [N // batch_size, 1] = [3, 1]
    assert losses.shape == (N // batch_size, 1)
    assert bool(jnp.all(jnp.isfinite(losses)))

    ref = reference_losses(params, sample_reps, data, labels, perm, batch_size)
    np.testing.assert_allclose(np.asarray(losses), np.asarray(ref), rtol=0.15, atol=0.08)
    print("KERNEL_OK")
</pallas_src>

<mosaic_0001>
module attributes {stable_mosaic.version = 11 : i64} {
  func.func @center_kernel(%arg0: i32, %arg1: memref<4x8xf32, #tpu.memory_space<vmem>>, %arg2: memref<4x8x32xf32, #tpu.memory_space<vmem>>, %arg3: memref<128x32xbf16, #tpu.memory_space<vmem>>, %arg4: memref<128x1xf32, #tpu.memory_space<vmem>>) attributes {dimension_semantics = [#tpu.dimension_semantics<arbitrary>], iteration_bounds = array<i64: 1>, scalar_prefetch = 0 : i64, scratch_operands = 0 : i64, tpu.core_type = #tpu.core_type<tc>, window_params = [{pipeline_mode = #tpu.pipeline_mode<synchronous>, transform_indices = @transform_0, window_bounds = array<i64: 4, 8>}, {pipeline_mode = #tpu.pipeline_mode<synchronous>, transform_indices = @transform_1, window_bounds = array<i64: 4, 8, 32>}, {pipeline_mode = #tpu.pipeline_mode<synchronous>, transform_indices = @transform_2, window_bounds = array<i64: 128, 32>}, {pipeline_mode = #tpu.pipeline_mode<synchronous>, transform_indices = @transform_3, window_bounds = array<i64: 128, 1>}]} {
    %c0 = arith.constant 0 : index
    %c0_0 = arith.constant 0 : index
    %0 = vector.load %arg1[%c0, %c0_0] : memref<4x8xf32, #tpu.memory_space<vmem>>, vector<4x8xf32>
    %cst = arith.constant dense<0xFF800000> : vector<4xf32>
    %1 = vector.multi_reduction <maximumf>, %0, %cst [1] : vector<4x8xf32> to vector<4xf32>
    %2 = vector.shape_cast %1 : vector<4xf32> to vector<4x1xf32>
    %3 = vector.broadcast %2 : vector<4x1xf32> to vector<4x8xf32>
    %4 = arith.subf %0, %3 : vector<4x8xf32>
    %5 = math.exp %4 : vector<4x8xf32>
    %cst_1 = arith.constant dense<0.000000e+00> : vector<4xf32>
    %6 = vector.multi_reduction <add>, %5, %cst_1 [1] : vector<4x8xf32> to vector<4xf32>
    %7 = vector.shape_cast %6 : vector<4xf32> to vector<4x1xf32>
    %8 = vector.broadcast %7 : vector<4x1xf32> to vector<4x8xf32>
    %9 = arith.divf %5, %8 : vector<4x8xf32>
    %c0_2 = arith.constant 0 : index
    %c0_3 = arith.constant 0 : index
    %c0_4 = arith.constant 0 : index
    %10 = vector.load %arg2[%c0_2, %c0_3, %c0_4] : memref<4x8x32xf32, #tpu.memory_space<vmem>>, vector<4x8x32xf32>
    %11 = vector.shape_cast %9 : vector<4x8xf32> to vector<4x1x8xf32>
    %cst_5 = arith.constant dense<0.000000e+00> : vector<4x1x32xf32>
    %12 = tpu.matmul %11, %10, %cst_5 {dimension_numbers = #tpu.dot_dimension_numbers<[2], [1], [1], [2], [0, 0, 0, 1, 1, 2], [0], [0]>} : vector<4x1x8xf32>, vector<4x8x32xf32>, vector<4x1x32xf32> -> vector<4x1x32xf32>
    %13 = vector.shape_cast %12 : vector<4x1x32xf32> to vector<4x32xf32>
    %14 = tpu.iota {dimensions = array<i32: 0>} : vector<128x4xi32>
    %15 = tpu.iota {dimensions = array<i32: 1>} : vector<128x4xi32>
    %16 = arith.cmpi eq, %14, %15 : vector<128x4xi32>
    %17 = arith.extui %16 : vector<128x4xi1> to vector<128x4xi32>
    %18 = arith.sitofp %17 : vector<128x4xi32> to vector<128x4xf32>
    %cst_6 = arith.constant dense<0.000000e+00> : vector<128x32xf32>
    %19 = tpu.matmul %18, %13, %cst_6 {dimension_numbers = #tpu.dot_dimension_numbers<[1], [0], [0], [1], [0, 0, 1, 1], [], []>} : vector<128x4xf32>, vector<4x32xf32>, vector<128x32xf32> -> vector<128x32xf32>
    %20 = arith.mulf %19, %19 : vector<128x32xf32>
    %cst_7 = arith.constant dense<0.000000e+00> : vector<128xf32>
    %21 = vector.multi_reduction <add>, %20, %cst_7 [1] : vector<128x32xf32> to vector<128xf32>
    %22 = vector.shape_cast %21 : vector<128xf32> to vector<128x1xf32>
    %23 = tpu.iota {dimensions = array<i32: 0>} : vector<128x1xi32>
    %c4_i32 = arith.constant 4 : i32
    %24 = vector.broadcast %c4_i32 : i32 to vector<128x1xi32>
    %25 = arith.cmpi slt, %23, %24 : vector<128x1xi32>
    %cst_8 = arith.constant 1.000000e+30 : f32
    %26 = vector.broadcast %cst_8 : f32 to vector<128x1xf32>
    %27 = arith.select %25, %22, %26 : vector<128x1xi1>, vector<128x1xf32>
    %c0_9 = arith.constant 0 : index
    %c0_10 = arith.constant 0 : index
    %28 = vector.load %arg4[%c0_9, %c0_10] : memref<128x1xf32, #tpu.memory_space<vmem>>, vector<128x1xf32>
    tpu.vector_store %arg4[%c0_9, %c0_10], %27 {strides = array<i32>} : memref<128x1xf32, #tpu.memory_space<vmem>>, vector<128x1xf32>,
    %cst_11 = arith.constant 2.000000e+00 : f32
    %29 = vector.broadcast %cst_11 : f32 to vector<128x32xf32>
    %30 = arith.mulf %29, %19 : vector<128x32xf32>
    %31 = arith.truncf %30 : vector<128x32xf32> to vector<128x32xbf16>
    %c0_12 = arith.constant 0 : index
    %c0_13 = arith.constant 0 : index
    %32 = vector.load %arg3[%c0_12, %c0_13] : memref<128x32xbf16, #tpu.memory_space<vmem>>, vector<128x32xbf16>
    tpu.vector_store %arg3[%c0_12, %c0_13], %31 {strides = array<i32>} : memref<128x32xbf16, #tpu.memory_space<vmem>>, vector<128x32xbf16>,
    return
  }
  func.func @transform_0(%arg0: i32) -> (i32, i32) {
    %c0_i32 = arith.constant 0 : i32
    %c0_i32_0 = arith.constant 0 : i32
    %c0_i32_1 = arith.constant 0 : i32
    return %c0_i32, %c0_i32_0 : i32, i32
  }
  func.func @transform_1(%arg0: i32) -> (i32, i32, i32) {
    %c0_i32 = arith.constant 0 : i32
    %c0_i32_0 = arith.constant 0 : i32
    %c0_i32_1 = arith.constant 0 : i32
    %c0_i32_2 = arith.constant 0 : i32
    return %c0_i32, %c0_i32_0, %c0_i32_1 : i32, i32, i32
  }
  func.func @transform_2(%arg0: i32) -> (i32, i32) {
    %c0_i32 = arith.constant 0 : i32
    %c0_i32_0 = arith.constant 0 : i32
    %c0_i32_1 = arith.constant 0 : i32
    return %c0_i32, %c0_i32_0 : i32, i32
  }
  func.func @transform_3(%arg0: i32) -> (i32, i32) {
    %c0_i32 = arith.constant 0 : i32
    %c0_i32_0 = arith.constant 0 : i32
    %c0_i32_1 = arith.constant 0 : i32
    return %c0_i32, %c0_i32_0 : i32, i32
  }
}

</mosaic_0001>

<bundles_post_ra>
// kernel: tpu_custom_call.1
= control target key start
LH: loop header
LB: loop body
LE: loop exit
PB: predicated region body
PF: predicated region fallthrough
CT: control target
= control target key end

     0   :  { %9 = vsyncpa [#allocation3], 0  ;;  %s870_s0 = inlined_call_operand.hbm [shape: f32[4,8], index: 0, kind: input, shape index: {}]   ;;  %s871_s1 = inlined_call_operand.hbm [shape: f32[4,8,32], index: 1, kind: input, shape index: {}]   ;;  %s872_s2 = inlined_call_operand.vmem [shape: bf16[128,32], index: 2, kind: output, shape index: {0}]   ;;  %s873_s3 = inlined_call_operand.vmem [shape: f32[128,1], index: 3, kind: output, shape index: {1}]  }
   0x1   :  { %s16_s14 = sshll.u32 %s870_s0, 4  ;;  %s17_s14 = int_to_ptr.hbm [resolvable:$true] %s16_s14 }
   0x2   :  { %10 = vsyncpa [#allocation5], 0  ;;  %s638_s15 = smov [#allocation2]   ;;  %s26_s19 = sshll.u32 %s871_s1, 4  ;;  %s27_s19 = int_to_ptr.hbm [resolvable:$true] %s26_s19 }
   0x3   :  { %s18_s16 = sshll.u32 %s638_s15, 4  ;;  %s639_s20 = smov [#allocation4]   ;;  %s19_s16 = int_to_ptr.vmem [resolvable:$true] %s18_s16 }
   0x4   :  { %21 = dma.hbm_to_vmem [thread:$0]  %s17_s14, 64, %s19_s16, [#allocation3]  }
   0x5   :  { %s28_s21 = sshll.u32 %s639_s20, 4  ;;  %s640_s22 = smov 128   ;;  %s29_s21 = int_to_ptr.vmem [resolvable:$true] %s28_s21 }
   0x6   :  { %s641_s23 = smov 8  }
   0x7   :  { %34 = dma.hbm_to_vmem [thread:$0]  %s27_s19, 512, %s29_s21, [#allocation5], %s640_s22, %s640_s22, %s641_s23  }
   0x8   :  { %634 = dma.done.wait [#allocation3], 64  }
   0x9   :  { %635 = vsyncadd [#allocation3], 4294967232 }
   0xa   :  { %636 = dma.done.wait [#allocation5], 512  }
   0xb   :  { %637 = vsyncadd [#allocation5], 4294966784  ;;  %vm44_vm0 = vcmask 60416   ;;  %v43_v0 = vld [vmem:[#allocation2] sm:$0xf]  ;;  %v69_v7 = vld [vmem:[#allocation4] sm:$0xff]  ;;  %v166_v26 = vlaneseq }
   0xc   :  { %v45_v1 = vsel %vm44_vm0, %v43_v0, -inf  ;;  %95 = vmatpush.msra.mxu0 %v69_v7  ;;  %v70_v8 = vld [vmem:[#allocation4 + $0x8] sm:$0xff]  ;;  %v71_v9 = vld [vmem:[#allocation4 + $0x10] sm:$0xff]  ;;  %v72_v10 = vld [vmem:[#allocation4 + $0x18] sm:$0xff]  ;;  %vm77_vm5 = vcmask 64512   ;;  %vm238_vm6 = vcmask 1041409  }
   0xd   :  { %46 = vmax.xlane.f32.xlu0 %v45_v1  ;;  %117 = vmatpush.msra.mxu1 %v70_v8  ;;  %v670_v28 = vshrl.u32 %v166_v26, 7  ;;  %v672_v29 = vand.u32 127, %v166_v26  ;;  %vm241_vm7 = vcmask 1042434   ;;  %vm244_vm8 = vcmask 1043459  }
   0xe   :  { %139 = vmatpush.msra.mxu2 %v71_v9  ;;  %161 = vmatpush.msra.mxu3 %v72_v10  ;;  %vm295_vm9 = vcmask 1043456   ;;  %v642_v42 = vmov 0.0   ;;  %vm246_vm14 = vcmask 31744  }
   0xf   :  { %v175_v30 = vadd.s32 64, %v670_v28  ;;  %v179_v32 = vadd.s32 96, %v670_v28  ;;  %v171_v33 = vadd.s32 32, %v670_v28  ;;  %vm185_vm10 = vcmp.eq.s32.totalorder %v670_v28, %v672_v29 }
  0x10   :  { %v540_v43 = vsel %vm185_vm10, 1.0, %v642_v42  ;;  %v176_v47 = vadd.s32 72, %v670_v28  ;;  %v168_v48 = vadd.s32 8, %v670_v28  ;;  %v180_v49 = vadd.s32 104, %v670_v28 }
  0x11   :  { %vm193_vm11 = vcmp.eq.s32.totalorder %v175_v30, %v672_v29  ;;  %vm197_vm12 = vcmp.eq.s32.totalorder %v179_v32, %v672_v29  ;;  %vm189_vm13 = vcmp.eq.s32.totalorder %v171_v33, %v672_v29  ;;  %v172_v50 = vadd.s32 40, %v670_v28 }
  0x12   :  { %v548_v44 = vsel %vm193_vm11, 1.0, %v642_v42  ;;  %v552_v45 = vsel %vm197_vm12, 1.0, %v642_v42  ;;  %v544_v46 = vsel %vm189_vm13, 1.0, %v642_v42  ;;  %vm194_vm15 = vcmp.eq.s32.totalorder %v176_v47, %v672_v29 }
  0x13   :  { %v549_v51 = vsel %vm194_vm15, 1.0, %v642_v42  ;;  %v177_v55 = vadd.s32 80, %v670_v28  ;;  %v169_v56 = vadd.s32 16, %v670_v28  ;;  %v181_v57 = vadd.s32 112, %v670_v28 }
  0x14   :  { %v173_v58 = vadd.s32 48, %v670_v28  ;;  %v178_v63 = vadd.s32 88, %v670_v28  ;;  %v182_v1 = vadd.s32 120, %v670_v28  ;;  %vm379_vm11 = vcmask 261120  }
  0x15   :  { %vm509_vm12 = vcmask 257024   ;;  %vm460_vm13 = vcmask 7168  }
  0x80   :  { %v47_v2 = vpop.xlane.xlu0 %46 }
  0x81   :  { %v48_v3 = vsub.f32 %v43_v0, %v47_v2  ;;  %v170_v0 = vadd.s32 24, %v670_v28  ;;  %v174_v2 = vadd.s32 56, %v670_v28 }
  0x83   :  { %v49_v4 = vmul.f32 1.442695, %v48_v3  ;;  %vm192_vm10 = vcmp.eq.s32.totalorder %v174_v2, %v672_v29 }
  0x85   :  { %582 = vpow2.f32 %v49_v4 }
  0x8b   :  { %v583_v5 = vpop.eup %582 }
  0x8c   :  { %v51_v6 = vsel %vm44_vm0, %v583_v5, 0.0  ;;  %vm186_vm0 = vcmp.eq.s32.totalorder %v168_v48, %v672_v29 }
  0x8d   :  { %52 = vadd.xlane.f32.xlu0 %v51_v6  ;;  %v541_v52 = vsel %vm186_vm0, 1.0, %v642_v42  ;;  %v547_v6 = vsel %vm192_vm10, 1.0, %v642_v42 }
 0x100   :  { %v53_v11 = vpop.xlane.xlu0 %52 }
 0x101   :  { %584 = vrcp.f32 %v53_v11  ;;  %v65_v15 = vand.u32 2147483648, %v53_v11  ;;  %v63_v17 = vand.u32 2147483647, %v53_v11  ;;  %vm59_vm2 = vweird.f32 %v53_v11 }
 0x103   :  { %v66_v19 = vor.u32 1.1754944e-38, %v65_v15  ;;  %vm64_vm4 = vcmp.eq.f32.partialorder %v63_v17, 8.507059e+37 }
 0x107   :  { %v585_v12 = vpop.eup %584 }
 0x108   :  { %v55_v13 = vmul.f32 %v585_v12, %v53_v11  ;;  %vm60_vm1 = vweird.f32 %v585_v12 }
 0x109   :  { %vm61_vm3 = vmor %vm59_vm2, %vm60_vm1  ;;  %vm198_vm1 = vcmp.eq.s32.totalorder %v180_v49, %v672_v29  ;;  %vm190_vm2 = vcmp.eq.s32.totalorder %v172_v50, %v672_v29 }
 0x10a   :  { %v56_v14 = vsub.f32 1.0, %v55_v13  ;;  %v553_v53 = vsel %vm198_vm1, 1.0, %v642_v42  ;;  %v545_v54 = vsel %vm190_vm2, 1.0, %v642_v42 }
 0x10c   :  { %v57_v16 = vmul.f32 %v585_v12, %v56_v14 }
 0x10e   :  { %v58_v18 = vadd.f32 %v585_v12, %v57_v16 }
 0x110   :  { %v62_v20 = vsel %vm61_vm3, %v585_v12, %v58_v18  ;;  %vm195_vm3 = vcmp.eq.s32.totalorder %v177_v55, %v672_v29  ;;  %v643_v18 = vmov 1e+30  }
 0x111   :  { %v67_v21 = vsel %vm64_vm4, %v66_v19, %v62_v20  ;;  %vm187_vm4 = vcmp.eq.s32.totalorder %v169_v56, %v672_v29  ;;  %v550_v59 = vsel %vm195_vm3, 1.0, %v642_v42  ;;  %462 = vst.msk [vmem:[%s873_s3 + $0x8] sm:$0xff] %vm460_vm13, %v643_v18 }
 0x112   :  { %v68_v22 = vmul.f32 %v583_v5, %v67_v21  ;;  %v542_v60 = vsel %vm187_vm4, 1.0, %v642_v42  ;;  %463 = vst.msk [vmem:[%s873_s3 + $0x10] sm:$0xff] %vm460_vm13, %v643_v18 }
 0x113   :  { %464 = vst.msk [vmem:[%s873_s3 + $0x18] sm:$0xff] %vm460_vm13, %v643_v18 }
 0x114   :  { %536 = vmatmul.msk.f32.vlgmr.msra.gmra.mxu0 %vm77_vm5, %v68_v22  ;;  %v74_v23 = vrot.slane %v68_v22, 1  ;;  %v75_v24 = vrot.slane %v68_v22, 2  ;;  %v76_v25 = vrot.slane %v68_v22, 3  ;;  %465 = vst.msk [vmem:[%s873_s3 + $0x20] sm:$0xff] %vm460_vm13, %v643_v18 }
 0x115   :  { %466 = vst.msk [vmem:[%s873_s3 + $0x28] sm:$0xff] %vm460_vm13, %v643_v18 }
 0x116   :  { %537 = vmatmul.msk.f32.vlgmr.msra.gmra.mxu1 %vm77_vm5, %v74_v23  ;;  %538 = vmatmul.msk.f32.vlgmr.msra.gmra.mxu2 %vm77_vm5, %v75_v24  ;;  %467 = vst.msk [vmem:[%s873_s3 + $0x30] sm:$0xff] %vm460_vm13, %v643_v18 }
 0x117   :  { %539 = vmatmul.msk.f32.vlgmr.msra.gmra.mxu3 %vm77_vm5, %v76_v25  ;;  %vm199_vm5 = vcmp.eq.s32.totalorder %v181_v57, %v672_v29  ;;  %468 = vst.msk [vmem:[%s873_s3 + $0x38] sm:$0xff] %vm460_vm13, %v643_v18 }
 0x118   :  { %v554_v61 = vsel %vm199_vm5, 1.0, %v642_v42  ;;  %469 = vst.msk [vmem:[%s873_s3 + $0x40] sm:$0xff] %vm460_vm13, %v643_v18 }
 0x119   :  { %470 = vst.msk [vmem:[%s873_s3 + $0x48] sm:$0xff] %vm460_vm13, %v643_v18 }
 0x11a   :  { %471 = vst.msk [vmem:[%s873_s3 + $0x50] sm:$0xff] %vm460_vm13, %v643_v18 }
 0x11b   :  { %472 = vst.msk [vmem:[%s873_s3 + $0x58] sm:$0xff] %vm460_vm13, %v643_v18 }
 0x11c   :  { %473 = vst.msk [vmem:[%s873_s3 + $0x60] sm:$0xff] %vm460_vm13, %v643_v18 }
 0x11d   :  { %474 = vst.msk [vmem:[%s873_s3 + $0x68] sm:$0xff] %vm460_vm13, %v643_v18 }
 0x11e   :  { %475 = vst.msk [vmem:[%s873_s3 + $0x70] sm:$0xff] %vm460_vm13, %v643_v18 }
 0x11f   :  { %476 = vst.msk [vmem:[%s873_s3 + $0x78] sm:$0xff] %vm460_vm13, %v643_v18 }
 0x191   :  { %v97_v35 = vpop.f32.mrf.mxu0 }
 0x193   :  { %v119_v27 = vpop.f32.mrf.mxu1 }
 0x194   :  { %v237_v31 = vrot.slane %v119_v27, 7 }
 0x196   :  { %v239_v38 = vsel %vm238_vm6, %v237_v31, %v97_v35  ;;  %vm191_vm6 = vcmp.eq.s32.totalorder %v173_v58, %v672_v29 }
 0x197   :  { %v546_v62 = vsel %vm191_vm6, 1.0, %v642_v42 }
 0x199   :  { %v141_v34 = vpop.f32.mrf.mxu2 }
 0x19a   :  { %v240_v36 = vrot.slane %v141_v34, 6  ;;  %v163_v37 = vpop.f32.mrf.mxu3 }
 0x19b   :  { %v243_v39 = vrot.slane %v163_v37, 5 }
 0x19c   :  { %v242_v40 = vsel %vm241_vm7, %v240_v36, %v239_v38  ;;  %vm196_vm7 = vcmp.eq.s32.totalorder %v178_v63, %v672_v29 }
 0x19d   :  { %v245_v41 = vsel %vm244_vm8, %v243_v39, %v242_v40  ;;  %vm188_vm8 = vcmp.eq.s32.totalorder %v170_v0, %v672_v29  ;;  %v551_v3 = vsel %vm196_vm7, 1.0, %v642_v42 }
 0x19e   :  { %556 = vmatpush.msk.msrb.mxu0 %vm295_vm9, %v245_v41  ;;  %573 = vmatpush.msk.msrb.mxu1 %vm295_vm9, %v245_v41  ;;  %v543_v4 = vsel %vm188_vm8, 1.0, %v642_v42 }
 0x19f   :  { %574 = vmatpush.msk.msrb.mxu2 %vm295_vm9, %v245_v41  ;;  %575 = vmatpush.msk.msrb.mxu3 %vm295_vm9, %v245_v41  ;;  %vm200_vm9 = vcmp.eq.s32.totalorder %v182_v1, %v672_v29 }
 0x1a0   :  { %557 = vmatmul.msk.f32.vlgmr.msrb.gmra.mxu0 %vm246_vm14, %v540_v43  ;;  %565 = vmatmul.msk.f32.vlgmr.msrb.gmra.mxu2 %vm246_vm14, %v548_v44  ;;  %v555_v5 = vsel %vm200_vm9, 1.0, %v642_v42 }
 0x1a1   :  { %569 = vmatmul.msk.f32.vlgmr.msrb.gmra.mxu3 %vm246_vm14, %v552_v45  ;;  %561 = vmatmul.msk.f32.vlgmr.msrb.gmra.mxu1 %vm246_vm14, %v544_v46 }
 0x1a8   :  { %566 = vmatmul.msk.f32.gmra.mxu2 %vm246_vm14, %v549_v51  ;;  %558 = vmatmul.msk.f32.gmra.mxu0 %vm246_vm14, %v541_v52 }
 0x1a9   :  { %570 = vmatmul.msk.f32.gmra.mxu3 %vm246_vm14, %v553_v53  ;;  %562 = vmatmul.msk.f32.gmra.mxu1 %vm246_vm14, %v545_v54 }
 0x1b0   :  { %567 = vmatmul.msk.f32.gmra.mxu2 %vm246_vm14, %v550_v59  ;;  %559 = vmatmul.msk.f32.gmra.mxu0 %vm246_vm14, %v542_v60 }
 0x1b1   :  { %571 = vmatmul.msk.f32.gmra.mxu3 %vm246_vm14, %v554_v61  ;;  %563 = vmatmul.msk.f32.gmra.mxu1 %vm246_vm14, %v546_v62 }
 0x1b8   :  { %568 = vmatmul.msk.f32.gmra.mxu2 %vm246_vm14, %v551_v3  ;;  %560 = vmatmul.msk.f32.gmra.mxu0 %vm246_vm14, %v543_v4 }
 0x1b9   :  { %572 = vmatmul.msk.f32.gmra.mxu3 %vm246_vm14, %v555_v5  ;;  %564 = vmatmul.msk.f32.gmra.mxu1 %vm246_vm14, %v547_v6  ;;  %vm428_vm14 = vcmp.lt.s32.totalorder %v670_v28, 4 }
 0x21d   :  { %v315_v7 = vpop.f32.mrf.mxu0 }
 0x21e   :  { %v477_v8 = vmul.f32 2.0, %v315_v7  ;;  %v363_v9 = vmul.f32 %v315_v7, %v315_v7  ;;  %v327_v10 = vpop.f32.mrf.mxu1 }
 0x21f   :  { %v481_v11 = vmul.f32 2.0, %v327_v10 }
 0x220   :  { %v493_v12 = vpack.c.bf16 %v477_v8, %v477_v8  ;;  %v380_v13 = vsel %vm379_vm11, %v363_v9, 0.0 }
 0x221   :  { %381 = vadd.xlane.f32.xlu1 %v380_v13  ;;  %v497_v14 = vpack.c.bf16 %v481_v11, %v481_v11 }
 0x222   :  { %510 = vst.msk [vmem:[%s872_s2] sm:$0xf] %vm509_vm12, %v493_v12 }
 0x223   :  { %514 = vst.msk [vmem:[%s872_s2 + $0x10] sm:$0xf] %vm509_vm12, %v497_v14  ;;  %v339_v15 = vpop.f32.mrf.mxu2 }
 0x224   :  { %v485_v16 = vmul.f32 2.0, %v339_v15  ;;  %v351_v17 = vpop.f32.mrf.mxu3 }
 0x225   :  { %v489_v19 = vmul.f32 2.0, %v351_v17  ;;  %v318_v20 = vpop.f32.mrf.mxu0 }
 0x226   :  { %v501_v21 = vpack.c.bf16 %v485_v16, %v485_v16  ;;  %v478_v22 = vmul.f32 2.0, %v318_v20  ;;  %v330_v23 = vpop.f32.mrf.mxu1 }
 0x227   :  { %v505_v24 = vpack.c.bf16 %v489_v19, %v489_v19  ;;  %v482_v25 = vmul.f32 2.0, %v330_v23 }
 0x228   :  { %518 = vst.msk [vmem:[%s872_s2 + $0x20] sm:$0xf] %vm509_vm12, %v501_v21  ;;  %v494_v26 = vpack.c.bf16 %v478_v22, %v478_v22 }
 0x229   :  { %522 = vst.msk [vmem:[%s872_s2 + $0x30] sm:$0xf] %vm509_vm12, %v505_v24  ;;  %v498_v27 = vpack.c.bf16 %v482_v25, %v482_v25 }
 0x22a   :  { %511 = vst.msk [vmem:[%s872_s2 + $0x4] sm:$0xf] %vm509_vm12, %v494_v26 }
 0x22b   :  { %515 = vst.msk [vmem:[%s872_s2 + $0x14] sm:$0xf] %vm509_vm12, %v498_v27  ;;  %v342_v29 = vpop.f32.mrf.mxu2 }
 0x22c   :  { %v486_v30 = vmul.f32 2.0, %v342_v29  ;;  %v354_v31 = vpop.f32.mrf.mxu3 }
 0x22d   :  { %v490_v32 = vmul.f32 2.0, %v354_v31  ;;  %v321_v33 = vpop.f32.mrf.mxu0 }
 0x22e   :  { %v502_v34 = vpack.c.bf16 %v486_v30, %v486_v30  ;;  %v479_v35 = vmul.f32 2.0, %v321_v33  ;;  %v333_v36 = vpop.f32.mrf.mxu1 }
 0x22f   :  { %v506_v37 = vpack.c.bf16 %v490_v32, %v490_v32  ;;  %v483_v38 = vmul.f32 2.0, %v333_v36 }
 0x230   :  { %519 = vst.msk [vmem:[%s872_s2 + $0x24] sm:$0xf] %vm509_vm12, %v502_v34  ;;  %v495_v39 = vpack.c.bf16 %v479_v35, %v479_v35 }
 0x231   :  { %523 = vst.msk [vmem:[%s872_s2 + $0x34] sm:$0xf] %vm509_vm12, %v506_v37  ;;  %v499_v40 = vpack.c.bf16 %v483_v38, %v483_v38 }
 0x232   :  { %512 = vst.msk [vmem:[%s872_s2 + $0x8] sm:$0xf] %vm509_vm12, %v495_v39 }
 0x233   :  { %516 = vst.msk [vmem:[%s872_s2 + $0x18] sm:$0xf] %vm509_vm12, %v499_v40  ;;  %v345_v41 = vpop.f32.mrf.mxu2 }
 0x234   :  { %v487_v42 = vmul.f32 2.0, %v345_v41  ;;  %v357_v43 = vpop.f32.mrf.mxu3 }
 0x235   :  { %v491_v44 = vmul.f32 2.0, %v357_v43  ;;  %v324_v45 = vpop.f32.mrf.mxu0 }
 0x236   :  { %v503_v46 = vpack.c.bf16 %v487_v42, %v487_v42  ;;  %v480_v47 = vmul.f32 2.0, %v324_v45  ;;  %v336_v48 = vpop.f32.mrf.mxu1 }
 0x237   :  { %v507_v49 = vpack.c.bf16 %v491_v44, %v491_v44  ;;  %v484_v50 = vmul.f32 2.0, %v336_v48 }
 0x238   :  { %520 = vst.msk [vmem:[%s872_s2 + $0x28] sm:$0xf] %vm509_vm12, %v503_v46  ;;  %v496_v51 = vpack.c.bf16 %v480_v47, %v480_v47 }
 0x239   :  { %524 = vst.msk [vmem:[%s872_s2 + $0x38] sm:$0xf] %vm509_vm12, %v507_v49  ;;  %v500_v52 = vpack.c.bf16 %v484_v50, %v484_v50 }
 0x23a   :  { %513 = vst.msk [vmem:[%s872_s2 + $0xc] sm:$0xf] %vm509_vm12, %v496_v51 }
 0x23b   :  { %517 = vst.msk [vmem:[%s872_s2 + $0x1c] sm:$0xf] %vm509_vm12, %v500_v52  ;;  %v348_v53 = vpop.f32.mrf.mxu2 }
 0x23c   :  { %v488_v54 = vmul.f32 2.0, %v348_v53  ;;  %v360_v55 = vpop.f32.mrf.mxu3 }
 0x23d   :  { %v492_v56 = vmul.f32 2.0, %v360_v55 }
 0x23e   :  { %v504_v57 = vpack.c.bf16 %v488_v54, %v488_v54 }
 0x23f   :  { %v508_v58 = vpack.c.bf16 %v492_v56, %v492_v56 }
 0x240   :  { %521 = vst.msk [vmem:[%s872_s2 + $0x2c] sm:$0xf] %vm509_vm12, %v504_v57 }
 0x241   :  { %525 = vst.msk [vmem:[%s872_s2 + $0x3c] sm:$0xf] %vm509_vm12, %v508_v58 }
 0x294   :  { %v382_v59 = vpop.xlane.xlu1 %381 }
 0x295   :  { %v444_v60 = vsel %vm428_vm14, %v382_v59, 1e+30 }
 0x296   :  { %461 = vst.msk [vmem:[%s873_s3] sm:$0xff] %vm460_vm13, %v444_v60 }
 0x297   :  { %534 = vsyncpa [#allocation3], 1 }
 0x298   :  { %535 = vsyncpa [#allocation5], 1 }

</bundles_post_ra>
